<compile_context>
chip_gen: v7x
topology: tpu7x:2x2x1
jax: 0.10.0
libtpu: 0.0.40
codegen_flags: <defaults>
</compile_context>

<pallas_src>
import functools

import jax
import jax.numpy as jnp
from jax.experimental import pallas as pl
from jax.experimental.pallas import tpu as pltpu


_FUSED_SLAB_BUDGET = 6 << 20   # f32 bytes per (tn, C, S) block in the fused path
_FUSED_VMEM_LIMIT = 48 << 20   # explicit scoped-VMEM request (< v7x 64 MiB phys)


def _round_up(x, m):
  return ((x + m - 1) // m) * m


def _fused_batch_tile(n, per_sample_f32_bytes):
  """Largest divisor of n whose slab fits the budget; keep grid >= 2 if n > 1.

  Returns 0 if even a single sample does not fit (use the fallback path).
  """
  tn = 0
  for d in range(1, n + 1):
    if n % d:
      continue
    if d * per_sample_f32_bytes > _FUSED_SLAB_BUDGET:
      break
    if n // d >= 2 or n == 1:
      tn = d
  return tn


# ---------------------------------------------------------------------------
# Fused path: pool + MLP + sigmoid + scale in one kernel (1 read + 1 write).
# ---------------------------------------------------------------------------
def _fused_kernel(x_ref, w1_ref, b1_ref, w2_ref, b2_ref, o_ref, *, inv_s):
  """x_ref/o_ref: (tn, C, S); w1: (C, Cr); b1: (1, Cr); w2: (Cr, C); b2: (1, C)."""
  avg = jnp.sum(x_ref[...].astype(jnp.float32), axis=-1) * inv_s        # (tn, C)
  hid = jnp.maximum(
      jnp.dot(avg, w1_ref[...], preferred_element_type=jnp.float32)
      + b1_ref[...], 0.0)                                               # (tn, Cr)
  z = (jnp.dot(hid, w2_ref[...], preferred_element_type=jnp.float32)
       + b2_ref[...])                                                   # (tn, C)
  scale = 1.0 / (1.0 + jnp.exp(-z))                                     # sigmoid
  o_ref[...] = (x_ref[...].astype(jnp.float32)
                * scale[:, :, None]).astype(o_ref.dtype)


# ---------------------------------------------------------------------------
# Fallback path (huge H*W): two streaming passes over the flat (N*C, S) view.
# ---------------------------------------------------------------------------
def _pool_sum_kernel(x_ref, sum_ref, acc_ref, *, n_chunks):
  """Per-row spatial sums.

  x_ref   : (tr, ts)   spatial tile
  sum_ref : (tr, 1)    per-row spatial sum (output)
  acc_ref : (tr, 128)  lane-partial running sums (VMEM scratch, f32)
  """
  j = pl.program_id(1)

  @pl.when(j == 0)
  def _():
    acc_ref[...] = jnp.zeros_like(acc_ref)

  xf = x_ref[...].astype(jnp.float32)
  acc = acc_ref[...]
  for k in range(n_chunks):              # lane-aligned VALU adds; no per-tile XLU
    acc = acc + xf[:, k * 128:(k + 1) * 128]
  acc_ref[...] = acc

  @pl.when(j == pl.num_programs(1) - 1)
  def _():
    # Single cross-lane (XLU) reduce per row tile, only at finalize.
    sum_ref[...] = jnp.sum(acc_ref[...], axis=-1, keepdims=True)


def _scale_kernel(x_ref, s_ref, o_ref):
  """o = x * s.  x_ref/o_ref: (tr, ts); s_ref: (tr, 1) broadcast along lanes."""
  o_ref[...] = (x_ref[...].astype(jnp.float32) * s_ref[...]).astype(o_ref.dtype)


# ---------------------------------------------------------------------------
# Wrapper
# ---------------------------------------------------------------------------
def calayer_pallas(x_nchw, w1, b1, w2, b2, *, force_fallback=False):
  """Channel attention layer.

  x_nchw : (N, C, H, W)
  w1     : (C, Cr), b1: (Cr,)   -- squeeze 1x1 conv
  w2     : (Cr, C), b2: (C,)    -- excite 1x1 conv
  """
  n, c, h, w = x_nchw.shape
  cr = w1.shape[1]
  s = h * w

  x3 = x_nchw.reshape(n, c, s)
  w1f = w1.astype(jnp.float32)
  w2f = w2.astype(jnp.float32)
  b1r = b1.reshape(1, cr).astype(jnp.float32)
  b2r = b2.reshape(1, c).astype(jnp.float32)

  per_sample_f32 = c * s * 4
  tn = 0 if force_fallback else _fused_batch_tile(n, per_sample_f32)

  # ----------------------------- fused path --------------------------------
  if tn:
    kernel = functools.partial(_fused_kernel, inv_s=1.0 / float(s))
    out3 = pl.pallas_call(
        kernel,
        out_shape=jax.ShapeDtypeStruct((n, c, s), x_nchw.dtype),
        grid_spec=pltpu.PrefetchScalarGridSpec(
            num_scalar_prefetch=0,
            grid=(n // tn,),
            in_specs=[
                pl.BlockSpec((tn, c, s), lambda i: (i, 0, 0)),   # x slab
                pl.BlockSpec((c, cr), lambda i: (0, 0)),         # w1 (resident)
                pl.BlockSpec((1, cr), lambda i: (0, 0)),         # b1
                pl.BlockSpec((cr, c), lambda i: (0, 0)),         # w2
                pl.BlockSpec((1, c), lambda i: (0, 0)),          # b2
            ],
            out_specs=pl.BlockSpec((tn, c, s), lambda i: (i, 0, 0)),
        ),
        compiler_params=pltpu.CompilerParams(
            dimension_semantics=("parallel",),
            vmem_limit_bytes=_FUSED_VMEM_LIMIT),
    )(x3, w1f, b1r, w2f, b2r)
    return out3.reshape(n, c, h, w)

  # --------------------------- fallback path -------------------------------
  r = n * c
  x2 = x3.reshape(r, s)

  ts = min(2048, _round_up(s, 128))   # lane (spatial) tile, >=512 when S >= 512
  tr = min(256, _round_up(r, 8))      # sublane (row) tile
  sp = _round_up(s, ts)
  rp = _round_up(r, tr)
  if (rp, sp) != (r, s):
    # Zero padding: does not perturb the sums; padded rows/cols are sliced off.
    x2 = jnp.pad(x2, ((0, rp - r), (0, sp - s)))

  # Pass 1: per-row spatial sums (row axis parallel, spatial axis = reduction).
  pool = functools.partial(_pool_sum_kernel, n_chunks=ts // 128)
  row_sums = pl.pallas_call(
      pool,
      out_shape=jax.ShapeDtypeStruct((rp, 1), jnp.float32),
      grid_spec=pltpu.PrefetchScalarGridSpec(
          num_scalar_prefetch=0,
          grid=(rp // tr, sp // ts),
          in_specs=[pl.BlockSpec((tr, ts), lambda i, j: (i, j))],
          out_specs=pl.BlockSpec((tr, 1), lambda i, j: (i, 0)),
          scratch_shapes=[pltpu.VMEM((tr, 128), jnp.float32)],
      ),
      compiler_params=pltpu.CompilerParams(
          dimension_semantics=("parallel", "arbitrary")),
  )(x2)

  # Tiny squeeze/excite MLP + sigmoid in plain JAX (~N*C*Cr*4 FLOPs).
  mean = row_sums[:r, 0].reshape(n, c) * (1.0 / float(s))
  hid = jnp.maximum(mean @ w1f + b1r, 0.0)
  scale = jax.nn.sigmoid(hid @ w2f + b2r)                 # (N, C)
  scale = scale.reshape(r, 1)
  if rp != r:
    scale = jnp.pad(scale, ((0, rp - r), (0, 0)))

  # Pass 2: streaming x * scale.
  outp = pl.pallas_call(
      _scale_kernel,
      out_shape=jax.ShapeDtypeStruct((rp, sp), x_nchw.dtype),
      grid_spec=pltpu.PrefetchScalarGridSpec(
          num_scalar_prefetch=0,
          grid=(rp // tr, sp // ts),
          in_specs=[
              pl.BlockSpec((tr, ts), lambda i, j: (i, j)),
              pl.BlockSpec((tr, 1), lambda i, j: (i, 0)),
          ],
          out_specs=pl.BlockSpec((tr, ts), lambda i, j: (i, j)),
      ),
      compiler_params=pltpu.CompilerParams(
          dimension_semantics=("parallel", "parallel")),
  )(x2, scale)

  return outp[:r, :s].reshape(n, c, h, w)


def calayer_ref(x, w1, b1, w2, b2):
  """Pure-JAX reference for validation."""
  y = jnp.mean(x, axis=(2, 3))                         # (N, C)
  y = jnp.maximum(y @ w1 + b1, 0.0)                    # (N, Cr)
  y = jax.nn.sigmoid(y @ w2 + b2)                      # (N, C)
  return x * y[:, :, None, None]


if __name__ == "__main__":
  # Small shapes consistent with the module: CALayer(channel=64, reduction=16).
  N, C, H, W = 2, 64, 16, 16
  REDUCTION = 16
  CR = C // REDUCTION

  key = jax.random.PRNGKey(0)
  kx, kw1, kb1, kw2, kb2 = jax.random.split(key, 5)

  x = jax.random.normal(kx, (N, C, H, W), dtype=jnp.float32)
  bound1 = 1.0 / (C ** 0.5)    # fan_in of the squeeze 1x1 conv
  w1 = jax.random.uniform(kw1, (C, CR), jnp.float32, -bound1, bound1)
  b1 = jax.random.uniform(kb1, (CR,), jnp.float32, -bound1, bound1)
  bound2 = 1.0 / (CR ** 0.5)   # fan_in of the excite 1x1 conv
  w2 = jax.random.uniform(kw2, (CR, C), jnp.float32, -bound2, bound2)
  b2 = jax.random.uniform(kb2, (C,), jnp.float32, -bound2, bound2)

  ref = calayer_ref(x, w1, b1, w2, b2)

  # Default (fused single-pass) path.
  out = jax.block_until_ready(calayer_pallas(x, w1, b1, w2, b2))
  assert out.shape == (N, C, H, W)
  err = float(jnp.max(jnp.abs(out - ref)))
  assert jnp.allclose(out, ref, atol=1e-4, rtol=1e-4), err

  # Also exercise the large-slab fallback path (cheap at this shape).
  out_fb = jax.block_until_ready(
      calayer_pallas(x, w1, b1, w2, b2, force_fallback=True))
  err_fb = float(jnp.max(jnp.abs(out_fb - ref)))
  assert jnp.allclose(out_fb, ref, atol=1e-4, rtol=1e-4), err_fb

  print("KERNEL_OK")
</pallas_src>

<mosaic_0001>
module attributes {stable_mosaic.version = 11 : i64} {
  func.func @_fused_kernel(%arg0: i32, %arg1: memref<1x64x256xf32, #tpu.memory_space<vmem>>, %arg2: memref<64x4xf32, #tpu.memory_space<vmem>>, %arg3: memref<1x4xf32, #tpu.memory_space<vmem>>, %arg4: memref<4x64xf32, #tpu.memory_space<vmem>>, %arg5: memref<1x64xf32, #tpu.memory_space<vmem>>, %arg6: memref<1x64x256xf32, #tpu.memory_space<vmem>>) attributes {dimension_semantics = [#tpu.dimension_semantics<parallel>], iteration_bounds = array<i64: 2>, scalar_prefetch = 0 : i64, scratch_operands = 0 : i64, tpu.core_type = #tpu.core_type<tc>, window_params = [{transform_indices = @transform_0, window_bounds = array<i64: 1, 64, 256>}, {pipeline_mode = #tpu.pipeline_mode<synchronous>, transform_indices = @transform_1, window_bounds = array<i64: 64, 4>}, {pipeline_mode = #tpu.pipeline_mode<synchronous>, transform_indices = @transform_2, window_bounds = array<i64: 1, 4>}, {pipeline_mode = #tpu.pipeline_mode<synchronous>, transform_indices = @transform_3, window_bounds = array<i64: 4, 64>}, {pipeline_mode = #tpu.pipeline_mode<synchronous>, transform_indices = @transform_4, window_bounds = array<i64: 1, 64>}, {transform_indices = @transform_5, window_bounds = array<i64: 1, 64, 256>}]} {
    %c0 = arith.constant 0 : index
    %c0_0 = arith.constant 0 : index
    %c0_1 = arith.constant 0 : index
    %0 = vector.load %arg1[%c0, %c0_0, %c0_1] : memref<1x64x256xf32, #tpu.memory_space<vmem>>, vector<1x64x256xf32>
    %cst = arith.constant dense<0.000000e+00> : vector<1x64xf32>
    %1 = vector.multi_reduction <add>, %0, %cst [2] : vector<1x64x256xf32> to vector<1x64xf32>
    %cst_2 = arith.constant 3.906250e-03 : f32
    %2 = vector.broadcast %cst_2 : f32 to vector<1x64xf32>
    %3 = arith.mulf %1, %2 : vector<1x64xf32>
    %c0_3 = arith.constant 0 : index
    %c0_4 = arith.constant 0 : index
    %4 = vector.load %arg2[%c0_3, %c0_4] : memref<64x4xf32, #tpu.memory_space<vmem>>, vector<64x4xf32>
    %cst_5 = arith.constant dense<0.000000e+00> : vector<1x4xf32>
    %5 = tpu.matmul %3, %4, %cst_5 {dimension_numbers = #tpu.dot_dimension_numbers<[1], [0], [0], [1], [0, 0, 1, 1], [], []>} : vector<1x64xf32>, vector<64x4xf32>, vector<1x4xf32> -> vector<1x4xf32>
    %c0_6 = arith.constant 0 : index
    %c0_7 = arith.constant 0 : index
    %6 = vector.load %arg3[%c0_6, %c0_7] : memref<1x4xf32, #tpu.memory_space<vmem>>, vector<1x4xf32>
    %7 = arith.addf %5, %6 : vector<1x4xf32>
    %cst_8 = arith.constant 0.000000e+00 : f32
    %8 = vector.broadcast %cst_8 : f32 to vector<1x4xf32>
    %9 = arith.maximumf %7, %8 : vector<1x4xf32>
    %c0_9 = arith.constant 0 : index
    %c0_10 = arith.constant 0 : index
    %10 = vector.load %arg4[%c0_9, %c0_10] : memref<4x64xf32, #tpu.memory_space<vmem>>, vector<4x64xf32>
    %cst_11 = arith.constant dense<0.000000e+00> : vector<1x64xf32>
    %11 = tpu.matmul %9, %10, %cst_11 {dimension_numbers = #tpu.dot_dimension_numbers<[1], [0], [0], [1], [0, 0, 1, 1], [], []>} : vector<1x4xf32>, vector<4x64xf32>, vector<1x64xf32> -> vector<1x64xf32>
    %c0_12 = arith.constant 0 : index
    %c0_13 = arith.constant 0 : index
    %12 = vector.load %arg5[%c0_12, %c0_13] : memref<1x64xf32, #tpu.memory_space<vmem>>, vector<1x64xf32>
    %13 = arith.addf %11, %12 : vector<1x64xf32>
    %cst_14 = arith.constant 0.000000e+00 : f32
    %14 = vector.broadcast %cst_14 : f32 to vector<1x64xf32>
    %15 = arith.subf %14, %13 : vector<1x64xf32>
    %16 = math.exp %15 : vector<1x64xf32>
    %cst_15 = arith.constant 1.000000e+00 : f32
    %17 = vector.broadcast %cst_15 : f32 to vector<1x64xf32>
    %18 = arith.addf %17, %16 : vector<1x64xf32>
    %cst_16 = arith.constant 1.000000e+00 : f32
    %19 = vector.broadcast %cst_16 : f32 to vector<1x64xf32>
    %20 = arith.divf %19, %18 : vector<1x64xf32>
    %c0_17 = arith.constant 0 : index
    %c0_18 = arith.constant 0 : index
    %c0_19 = arith.constant 0 : index
    %21 = vector.load %arg1[%c0_17, %c0_18, %c0_19] : memref<1x64x256xf32, #tpu.memory_space<vmem>>, vector<1x64x256xf32>
    %22 = vector.shape_cast %20 : vector<1x64xf32> to vector<1x64x1xf32>
    %23 = vector.broadcast %22 : vector<1x64x1xf32> to vector<1x64x256xf32>
    %24 = arith.mulf %21, %23 : vector<1x64x256xf32>
    %c0_20 = arith.constant 0 : index
    %c0_21 = arith.constant 0 : index
    %c0_22 = arith.constant 0 : index
    %25 = vector.load %arg6[%c0_20, %c0_21, %c0_22] : memref<1x64x256xf32, #tpu.memory_space<vmem>>, vector<1x64x256xf32>
    tpu.vector_store %arg6[%c0_20, %c0_21, %c0_22], %24 {strides = array<i32>} : memref<1x64x256xf32, #tpu.memory_space<vmem>>, vector<1x64x256xf32>,
    return
  }
  func.func @transform_0(%arg0: i32) -> (i32, i32, i32) {
    %c0_i32 = arith.constant 0 : i32
    %c0_i32_0 = arith.constant 0 : i32
    %c0_i32_1 = arith.constant 0 : i32
    return %arg0, %c0_i32, %c0_i32_0 : i32, i32, i32
  }
  func.func @transform_1(%arg0: i32) -> (i32, i32) {
    %c0_i32 = arith.constant 0 : i32
    %c0_i32_0 = arith.constant 0 : i32
    %c0_i32_1 = arith.constant 0 : i32
    return %c0_i32, %c0_i32_0 : i32, i32
  }
  func.func @transform_2(%arg0: i32) -> (i32, i32) {
    %c0_i32 = arith.constant 0 : i32
    %c0_i32_0 = arith.constant 0 : i32
    %c0_i32_1 = arith.constant 0 : i32
    return %c0_i32, %c0_i32_0 : i32, i32
  }
  func.func @transform_3(%arg0: i32) -> (i32, i32) {
    %c0_i32 = arith.constant 0 : i32
    %c0_i32_0 = arith.constant 0 : i32
    %c0_i32_1 = arith.constant 0 : i32
    return %c0_i32, %c0_i32_0 : i32, i32
  }
  func.func @transform_4(%arg0: i32) -> (i32, i32) {
    %c0_i32 = arith.constant 0 : i32
    %c0_i32_0 = arith.constant 0 : i32
    %c0_i32_1 = arith.constant 0 : i32
    return %c0_i32, %c0_i32_0 : i32, i32
  }
  func.func @transform_5(%arg0: i32) -> (i32, i32, i32) {
    %c0_i32 = arith.constant 0 : i32
    %c0_i32_0 = arith.constant 0 : i32
    %c0_i32_1 = arith.constant 0 : i32
    return %arg0, %c0_i32, %c0_i32_0 : i32, i32, i32
  }
}

</mosaic_0001>

<bundles_post_ra>
// kernel: tpu_custom_call.1
= control target key start
LH: loop header
LB: loop body
LE: loop exit
PB: predicated region body
PF: predicated region fallthrough
CT: control target
= control target key end

     0   :  { %10 = vsyncpa [#allocation3], 0  ;;  %s1231_s0 = inlined_call_operand.hbm [shape: f32[2,64,256], index: 0, kind: input, shape index: {}]   ;;  %s1232_s1 = inlined_call_operand.vmem [shape: f32[64,4], index: 1, kind: input, shape index: {}]   ;;  %s1233_s2 = inlined_call_operand.vmem [shape: f32[1,4], index: 2, kind: input, shape index: {}]   ;;  %s1234_s3 = inlined_call_operand.vmem [shape: f32[4,64], index: 3, kind: input, shape index: {}]   ;;  %s1235_s4 = inlined_call_operand.vmem [shape: f32[1,64], index: 4, kind: input, shape index: {}]   ;;  %s1236_s5 = inlined_call_operand.hbm [shape: f32[2,64,256], index: 5, kind: output, shape index: {}]  }
   0x1   :  { %12 = vsyncpa [#allocation3 + $0x1], 0 }
   0x2   :  { %13 = vsyncpa [#allocation4], 0 }
   0x3   :  { %15 = vsyncpa [#allocation4 + $0x1], 0  ;;  %s937_s18 = smov 0   ;;  %s939_s19 = smov 0  }
   0x4   :  { %s941_s20 = smov 0   ;;  %s943_s21 = smov 0  }
   0x5 LB: > { %s958_s22 = sadd.s32 4294967295, %s896_s21   ;;  %s677_s23 = sadd.s32 4294967294, %s896_s21   ;;  %s896_s21 = sphi %s943_s21, %s1249_s21   ;;  %s892_s20 = sphi %s941_s20, %s1248_s20   ;;  %s888_s19 = sphi %s939_s19, %s1247_s19   ;;  %s884_s18 = sphi %s937_s18, %s1246_s18  }
   0x6   : > { %s962_s24 = sadd.s32 1, %s896_s21   ;;  %s28_s25 = sadd.s32 1, %s892_s20 }
   0x7   : > { %s25_s26 = ssub.s32 %s896_s21, %s962_s24  ;;  %p35_p0 = scmp.ne.s32.totalorder %s892_s20, %s888_s19 }
   0x8   : > { %p26_p1 = scmp.eq.s32.totalorder %s25_s26, 0  ;;  %p36_p2 = scmp.eq.s32.totalorder %s896_s21, 0 }
   0x9   : > { %p41_p3 = scmp.ne.s32.totalorder %s888_s19, %s884_s18  ;;  %p42_p4 = scmp.eq.s32.totalorder %s958_s22, 0 }
   0xa   : > { %s974_s27 = scalar_select %p26_p1, %s892_s20, %s28_s25  }
   0xb   : > { %p976_p5 = por %p36_p2, %p35_p0  ;;  %p980_p6 = por %p42_p4, %p41_p3 }
   0xc   : > { %p149_p7 = scmp.eq.s32.totalorder %s958_s22, 1  ;;  %p155_p8 = scmp.eq.s32.totalorder %s677_s23, 1 }
   0xd   : > { %p755_p10 = scmp.lt.s32.totalorder %s896_s21, 2  ;;  %s187_s7 = sand.u32 1, %s892_s20  }
   0xe   : > { %p987_p11 = por %p149_p7, %p35_p0  ;;  %p991_p12 = por %p155_p8, %p41_p3 }
   0xf   : > { %s694_s8 = sshll.u32 %s896_s21, 11  ;;  %s680_s9 = sshll.u32 %s187_s7, 7 }
  0x10   : > { %s1240_s30 = scalar_select %p987_p11, 1, 0 }
  0x11   : > { %s1241_s6 = scalar_select %p991_p12, 1, 0 }
  0x12   : > { %s1000_s12 = scalar_lea.hbm %s1231_s0, %s694_s8  ;;  %s191_s13 = scalar_lea.vmem [#allocation2], %s680_s9 }
  0x13   : > { %s198_s14 = sshll.u32 %s191_s13, 4  ;;  %p1004_p13 = pnand %p755_p10, %p976_p5  ;;  %s1008_s14 = int_to_ptr.vmem [resolvable:$true] %s198_s14 }
  0x14   : > { %s1010_s16 = scalar_lea.sflag [#allocation3], %s187_s7  ;;  %s800_s17 = scalar_lea.hbm %s1000_s12, 2048 }
  0x15   : > { %p801_p0 = scmp.ne.s32.totalorder %s1000_s12, %s800_s17  ;;  %p802_p1 = pneg %p1004_p13 }
  0x16   : > { %s805_s26 = scalar_lea.hbm %s1231_s0, 4096  ;;  %p806_p4 = scmp.lt.u32.totalorder %s1000_s12, %s1231_s0 }
  0x17   : > { %p803_p2 = pnand %p802_p1, %p801_p0  ;;  %p807_p5 = scmp.lt.u32.totalorder %s805_s26, %s800_s17 }
  0x18   : > { %p809_p8 = scmp.lt.u32.totalorder %s800_s17, %s1000_s12 }
  0x19   : > { %p804_p3 = pneg %p803_p2  ;;  %p808_p7 = por %p807_p5, %p806_p4 }
  0x1b   : > { %p810_p10 = por %p809_p8, %p808_p7 }
  0x1d   : > { %p811_p9 = pnand %p810_p10, %p804_p3 }
  0x1f   : > { %814 = shalt.err (!%p811_p9)
}
  0x20   : > { %s815_s7 = scalar_lea.vmem %s1008_s14, 2048  ;;  %s898_s9 = smov [#allocation2]  }
  0x21   : > { %p816_p0 = scmp.ne.s32.totalorder %s1008_s14, %s815_s7  ;;  %s820_s10 = sshll.u32 %s898_s9, 4  ;;  %s821_s10 = int_to_ptr.vmem [resolvable:$false] %s820_s10 }
  0x22   : > { %s822_s11 = scalar_lea.vmem %s821_s10, 4096  ;;  %p823_p11 = scmp.lt.s32.totalorder %s1008_s14, %s821_s10 }
  0x23   : > { %p818_p2 = pnand %p816_p0, %p802_p1  ;;  %p824_p4 = scmp.lt.s32.totalorder %s822_s11, %s815_s7 }
  0x25   : > { %p819_p12 = pneg %p818_p2  ;;  %p825_p5 = por %p824_p4, %p823_p11 }
  0x27   : > { %p826_p7 = pnand %p825_p5, %p819_p12 }
  0x29   : > { %829 = shalt.err (!%p826_p7)
}
  0x2a   : > { %s899_s13 = smov 256   ;;  %s900_s17 = smov 16  }
  0x2b   : > { %750 = dma.hbm_to_vmem [thread:$0]  (!%p1004_p13), %s1000_s12, 2048, %s1008_s14, %s1010_s16, %s899_s13, %s899_s13, %s900_s17  }
  0x2c   : > { %p683_p9 = scmp.ge.s32.totalorder %s896_s21, 1  ;;  %p206_p1 = scmp.lt.s32.totalorder %s896_s21, 3 }
  0x2e   : > { %p207_p3 = pnand %p683_p9, %p206_p1 }
  0x2f   : > { %s1041_s23 = sand.u32 (!%p207_p3), 1, %s888_s19  }
  0x30   : > { %210 = sbr.rel (%p207_p3) target bundleno = 827 (0x33b), region = 40  ;;  %s684_s25 = sshll.u32 (!%p207_p3), %s1041_s23, 7 }
  0x31   : > { %s213_s26 = scalar_lea.sflag (!%p207_p3), [#allocation3], %s1041_s23  ;;  %s216_s28 = scalar_lea.vmem (!%p207_p3), [#allocation2], %s684_s25 }
  0x37   : > { %875 = dma.done.wait (%p980_p6), %s213_s26, 2048  }
  0x38   : > { %877 = vsyncadd (%p980_p6), %s213_s26, 4294965248  ;;  %v1051_v0 = vld [vmem:[%s216_s28] sm:$0xff]  ;;  %v1053_v1 = vld [vmem:[%s216_s28 + $0x8] sm:$0xff]  ;;  %v901_v27 = vmov 0.0|0.0   ;;  %vm902_vm0 = vmmov 0   ;;  %v903_v37 = vmov 0.0   ;;  %v308_v38 = vlaneseq }
  0x39   : > { %v1055_v2 = vld [vmem:[%s216_s28 + $0x20] sm:$0xff]  ;;  %v259_v3 = vadd.f32 %v1053_v1, %v1051_v0  ;;  %v1059_v4 = vld [vmem:[%s216_s28 + $0x28] sm:$0xff]  ;;  %v1061_v5 = vld [vmem:[%s216_s28 + $0x10] sm:$0xff]  ;;  %731 = vmatprep.subr.bf16.mxu0 %v901_v27  ;;  %723 = vmatprep.mubr.msk.f32.mxu0 %vm902_vm0, %v903_v37  ;;  %vm319_vm1 = vcmask 130112   ;;  %vm326_vm2 = vcmask 195712   ;;  %vm333_vm3 = vcmask 261312  }
  0x3a   : > { %v1063_v6 = vld [vmem:[%s216_s28 + $0x18] sm:$0xff]  ;;  %v265_v7 = vadd.f32 %v1059_v4, %v1055_v2  ;;  %v1067_v8 = vld [vmem:[%s216_s28 + $0x30] sm:$0xff]  ;;  %v1075_v12 = vld [vmem:[%s216_s28 + $0x40] sm:$0xff]  ;;  %726 = vmatprep.subr.mxu1 %v903_v37  ;;  %728 = vmatprep.mubr.msk.f32.mxu1 %vm902_vm0, %v903_v37  ;;  %v309_v39 = vand.u32 127, %v308_v38  ;;  %v1123_v40 = vshrl.u32 %v308_v38, 7  ;;  %vm340_vm4 = vcmask 326912  }
  0x3b   : > { %v1069_v9 = vld [vmem:[%s216_s28 + $0x38] sm:$0xff]  ;;  %260 = vadd.xlane.f32.xlu0 %v259_v3  ;;  %v262_v10 = vadd.f32 %v1063_v6, %v1061_v5  ;;  %v1077_v13 = vld [vmem:[%s216_s28 + $0x48] sm:$0xff]  ;;  %v1079_v14 = vld [vmem:[%s216_s28 + $0x50] sm:$0xff]  ;;  %vm347_vm5 = vcmask 392512   ;;  %vm354_vm6 = vcmask 458112   ;;  %vm361_vm7 = vcmask 523712  }
  0x3c   : > { %266 = vadd.xlane.f32.xlu1 %v265_v7  ;;  %v268_v11 = vadd.f32 %v1069_v9, %v1067_v8  ;;  %v1081_v15 = vld [vmem:[%s216_s28 + $0x58] sm:$0xff]  ;;  %v271_v16 = vadd.f32 %v1077_v13, %v1075_v12  ;;  %v1087_v18 = vld [vmem:[%s216_s28 + $0x60] sm:$0xff]  ;;  %v1089_v19 = vld [vmem:[%s216_s28 + $0x68] sm:$0xff]  ;;  %v314_v41 = vadd.s32 4294967288, %v309_v39  ;;  %v321_v43 = vadd.s32 4294967280, %v309_v39  ;;  %s1150_s10 = scalar_lea.vmem [#allocation5], %s684_s25 }
  0x3d   : > { %v274_v17 = vadd.f32 %v1081_v15, %v1079_v14  ;;  %v1091_v20 = vld [vmem:[%s216_s28 + $0x70] sm:$0xff]  ;;  %v1093_v21 = vld [vmem:[%s216_s28 + $0x78] sm:$0xff]  ;;  %v277_v22 = vadd.f32 %v1089_v19, %v1087_v18  ;;  %v291_v24 = vld [vmem:[%s1232_s1] sm:$0xff]  ;;  %v328_v44 = vadd.s32 4294967272, %v309_v39  ;;  %v312_v46 = vsub.s32 %v309_v39, %v1123_v40  ;;  %s695_s25 = sshll.u32 %s958_s22, 11  ;;  %s604_s11 = sshll.u32 %s1150_s10, 4  ;;  %s1183_s11 = int_to_ptr.vmem [resolvable:$true] %s604_s11 }
  0x3e   : > { %v280_v23 = vadd.f32 %v1093_v21, %v1091_v20  ;;  %v292_v25 = vld [vmem:[%s1232_s1 + $0x8] sm:$0xff]  ;;  %v293_v28 = vld [vmem:[%s1232_s1 + $0x10] sm:$0xff]  ;;  %v294_v29 = vld [vmem:[%s1232_s1 + $0x18] sm:$0xff]  ;;  %v317_v48 = vsub.s32 %v314_v41, %v1123_v40  ;;  %v335_v49 = vadd.s32 4294967264, %v309_v39  ;;  %v324_v50 = vsub.s32 %v321_v43, %v1123_v40  ;;  %s1181_s26 = scalar_lea.hbm %s1236_s5, %s695_s25  ;;  %s591_s22 = scalar_lea.sflag [#allocation4], %s1041_s23 }
  0x3f   : > { %263 = vadd.xlane.f32.xlu0 %v262_v10  ;;  %v732_v26 = vpack.c.bf16 %v292_v25, %v291_v24  ;;  %v735_v30 = vpack.c.bf16 %v294_v29, %v293_v28  ;;  %v295_v31 = vld [vmem:[%s1232_s1 + $0x20] sm:$0xff]  ;;  %v296_v32 = vld [vmem:[%s1232_s1 + $0x28] sm:$0xff]  ;;  %v297_v34 = vld [vmem:[%s1232_s1 + $0x30] sm:$0xff]  ;;  %v331_v53 = vsub.s32 %v328_v44, %v1123_v40  ;;  %v342_v54 = vadd.s32 4294967256, %v309_v39  ;;  %s830_s28 = scalar_lea.vmem %s1183_s11, 2048  ;;  %p1243_p11 = scmp.ne.s32.totalorder %s1240_s30, 0 }
  0x40   : > { %269 = vadd.xlane.f32.xlu1 %v268_v11  ;;  %v738_v33 = vpack.c.bf16 %v296_v32, %v295_v31  ;;  %v298_v35 = vld [vmem:[%s1232_s1 + $0x38] sm:$0xff]  ;;  %v338_v60 = vsub.s32 %v335_v49, %v1123_v40  ;;  %v349_v61 = vadd.s32 4294967248, %v309_v39  ;;  %v356_v10 = vadd.s32 4294967240, %v309_v39  ;;  %v437_v39 = vld [vmem:[%s1234_s3] sm:$0xf]  ;;  %p831_p6 = scmp.ne.s32.totalorder %s1183_s11, %s830_s28  ;;  %s904_s29 = smov [#allocation5]  }
  0x41   : > { %733 = vmatpush3.bf16.msra.mxu0 %v732_v26  ;;  %v741_v36 = vpack.c.bf16 %v298_v35, %v297_v34  ;;  %v345_v7 = vsub.s32 %v342_v54, %v1123_v40  ;;  %vm363_vm8 = vcmask 523264   ;;  %vm443_vm9 = vcmask 1043456   ;;  %v299_v41 = vld [vmem:[%s1233_s2] sm:$0x1]  ;;  %s834_s12 = sshll.u32 %s904_s29, 4  ;;  %s835_s12 = int_to_ptr.vmem [resolvable:$false] %s834_s12 }
  0x42   : > { %734 = vmatprep.subr.bf16.mxu0 %v901_v27  ;;  %v352_v26 = vsub.s32 %v349_v61, %v1123_v40  ;;  %v359_v29 = vsub.s32 %v356_v10, %v1123_v40  ;;  %727 = vmatpush3.msk.msra.mxu1 %vm443_vm9, %v437_v39  ;;  %vm439_vm10 = vcmask 31744   ;;  %v525_v54 = vsub.s32 0, %v1123_v40  ;;  %p832_p12 = pnand %p831_p6, %p1243_p11  ;;  %s836_s14 = scalar_lea.vmem %s835_s12, 4096 }
  0x43   : > { %272 = vadd.xlane.f32.xlu0 %v271_v16  ;;  %p837_p8 = scmp.lt.s32.totalorder %s1183_s11, %s835_s12  ;;  %p838_p10 = scmp.lt.s32.totalorder %s836_s14, %s830_s28 }
  0x44   : > { %275 = vadd.xlane.f32.xlu1 %v274_v17  ;;  %p833_p13 = pneg %p832_p12 }
  0x45   : > { %736 = vmatpush3.bf16.msra.mxu0 %v735_v30  ;;  %p839_p0 = por %p838_p10, %p837_p8 }
  0x46   : > { %737 = vmatprep.subr.bf16.mxu0 %v901_v27 }
  0x47   : > { %278 = vadd.xlane.f32.xlu0 %v277_v22  ;;  %p840_p2 = pnand %p839_p0, %p833_p13 }
  0x48   : > { %281 = vadd.xlane.f32.xlu1 %v280_v23 }
  0x49   : > { %739 = vmatpush3.bf16.msra.mxu0 %v738_v33 }
  0x4a   : > { %740 = vmatprep.subr.bf16.mxu0 %v901_v27 }
  0x4d   : > { %742 = vmatpush3.bf16.msra.mxu0 %v741_v36 }
  0xc8   : > { %v261_v42 = vpop.xlane.xlu0 %260 }
  0xc9   : > { %v267_v45 = vpop.xlane.xlu1 %266  ;;  %v283_v47 = vmul.f32 0.00390625, %v261_v42 }
  0xca   : > { %v285_v51 = vmul.f32 0.00390625, %v267_v45 }
  0xcb   : > { %v313_v58 = vrot.slane %v283_v47, %v312_v46  ;;  %v438_v46 = vld [vmem:[%s1235_s4] sm:$0x1] }
  0xcc   : > { %v264_v52 = vpop.xlane.xlu0 %263  ;;  %v325_v62 = vrot.slane %v285_v51, %v324_v50 }
  0xcd   : > { %v284_v55 = vmul.f32 0.00390625, %v264_v52  ;;  %v270_v56 = vpop.xlane.xlu1 %269 }
  0xce   : > { %v286_v57 = vmul.f32 0.00390625, %v270_v56 }
  0xcf   : > { %v318_v59 = vrot.slane %v284_v55, %v317_v48 }
  0xd0   : > { %v332_v63 = vrot.slane %v286_v57, %v331_v53  ;;  %v273_v3 = vpop.xlane.xlu0 %272 }
  0xd1   : > { %v320_v11 = vsel %vm319_vm1, %v318_v59, %v313_v58  ;;  %v287_v16 = vmul.f32 0.00390625, %v273_v3  ;;  %v276_v17 = vpop.xlane.xlu1 %275 }
  0xd2   : > { %v327_v22 = vsel %vm326_vm2, %v325_v62, %v320_v11  ;;  %v288_v23 = vmul.f32 0.00390625, %v276_v17 }
  0xd3   : > { %v334_v24 = vsel %vm333_vm3, %v332_v63, %v327_v22  ;;  %v339_v25 = vrot.slane %v287_v16, %v338_v60 }
  0xd4   : > { %v346_v27 = vrot.slane %v288_v23, %v345_v7  ;;  %v279_v28 = vpop.xlane.xlu0 %278 }
  0xd5   : > { %v341_v30 = vsel %vm340_vm4, %v339_v25, %v334_v24  ;;  %v289_v31 = vmul.f32 0.00390625, %v279_v28  ;;  %v282_v32 = vpop.xlane.xlu1 %281 }
  0xd6   : > { %v290_v33 = vmul.f32 0.00390625, %v282_v32  ;;  %v348_v35 = vsel %vm347_vm5, %v346_v27, %v341_v30 }
  0xd7   : > { %v353_v34 = vrot.slane %v289_v31, %v352_v26 }
  0xd8   : > { %v360_v36 = vrot.slane %v290_v33, %v359_v29 }
  0xd9   : > { %v355_v37 = vsel %vm354_vm6, %v353_v34, %v348_v35 }
  0xda   : > { %v362_v38 = vsel %vm361_vm7, %v360_v36, %v355_v37 }
  0xdb   : > { %724 = vmatmul.mubr.msk.f32.vlgmr.msra.gmra.mrb[0].mxu0 %vm363_vm8, %v362_v38 }
 0x1ae   : > { %v432_v42 = vpop.f32.mrb[0].mxu0 }
 0x1af   : > { %v433_v43 = vadd.f32 %v432_v42, %v299_v41  ;;  %v725_v44 = vpop.f32.mrb[1].mxu0 }
 0x1b1   : > { %v436_v45 = vmax.f32 %v433_v43, 0.0 }
 0x1b3   : > { %729 = vmatmul.mubr.msk.f32.vlgmr.msra.gmra.mrb[0].mxu1 %vm439_vm10, %v436_v45 }
 0x286   : > { %v513_v47 = vpop.f32.mrb[0].mxu1 }
 0x287   : > { %v514_v48 = vadd.f32 %v513_v47, %v438_v46  ;;  %v730_v49 = vpop.f32.mrb[1].mxu1 }
 0x289   : > { %v517_v50 = vsub.f32 0.0, %v514_v48 }
 0x28b   : > { %v518_v51 = vmul.f32 1.442695, %v517_v50 }
 0x28d   : > { %796 = vpow2.f32 %v518_v51 }
 0x297   : > { %v797_v52 = vpop.eup %796 }
 0x298   : > { %v520_v53 = vadd.f32 1.0, %v797_v52 }
 0x29a   : > { %798 = vrcp.f32 %v520_v53 }
 0x2a4   : > { %v799_v55 = vpop.eup %798 }
 0x2a5   : > { %v526_v56 = vrot.slane %v799_v55, %v525_v54 }
 0x2a7   : > { %532 = vbcast.lane.b32.xlu1 %v526_v56, 264  ;;  %528 = vbcast.lane.b32.xlu0 %v526_v56, 256 }
 0x2ab   : > { %536 = vbcast.lane.b32.xlu1 %v526_v56, 272  ;;  %544 = vbcast.lane.b32.xlu0 %v526_v56, 288 }
 0x2af   : > { %540 = vbcast.lane.b32.xlu1 %v526_v56, 280  ;;  %552 = vbcast.lane.b32.xlu0 %v526_v56, 304 }
 0x2b3   : > { %548 = vbcast.lane.b32.xlu1 %v526_v56, 296 }
 0x2b7   : > { %556 = vbcast.lane.b32.xlu1 %v526_v56, 312 }
 0x319   : > { %v533_v57 = vpop.permute.xlu1 %532  ;;  %v529_v58 = vpop.permute.xlu0 %528 }
 0x31a   : > { %v560_v59 = vmul.f32 %v533_v57, %v1061_v5  ;;  %v561_v60 = vmul.f32 %v533_v57, %v1063_v6  ;;  %v558_v61 = vmul.f32 %v529_v58, %v1051_v0  ;;  %v559_v40 = vmul.f32 %v529_v58, %v1053_v1 }
 0x31c   : > { %576 = vst [vmem:[%s1150_s10 + $0x10] sm:$0xff] %v560_v59  ;;  %577 = vst [vmem:[%s1150_s10 + $0x18] sm:$0xff] %v561_v60 }
 0x31d   : > { %574 = vst [vmem:[%s1150_s10] sm:$0xff] %v558_v61  ;;  %575 = vst [vmem:[%s1150_s10 + $0x8] sm:$0xff] %v559_v40  ;;  %v537_v5 = vpop.permute.xlu1 %536  ;;  %v545_v0 = vpop.permute.xlu0 %544 }
 0x31e   : > { %v562_v1 = vmul.f32 %v537_v5, %v1055_v2  ;;  %v563_v6 = vmul.f32 %v537_v5, %v1059_v4  ;;  %v566_v62 = vmul.f32 %v545_v0, %v1075_v12  ;;  %v567_v63 = vmul.f32 %v545_v0, %v1077_v13 }
 0x320   : > { %578 = vst [vmem:[%s1150_s10 + $0x20] sm:$0xff] %v562_v1  ;;  %579 = vst [vmem:[%s1150_s10 + $0x28] sm:$0xff] %v563_v6 }
 0x321   : > { %582 = vst [vmem:[%s1150_s10 + $0x40] sm:$0xff] %v566_v62  ;;  %583 = vst [vmem:[%s1150_s10 + $0x48] sm:$0xff] %v567_v63  ;;  %v541_v3 = vpop.permute.xlu1 %540  ;;  %v553_v7 = vpop.permute.xlu0 %552 }
 0x322   : > { %v564_v2 = vmul.f32 %v541_v3, %v1067_v8  ;;  %v565_v10 = vmul.f32 %v541_v3, %v1069_v9  ;;  %v570_v4 = vmul.f32 %v553_v7, %v1087_v18  ;;  %v571_v12 = vmul.f32 %v553_v7, %v1089_v19 }
 0x324   : > { %580 = vst [vmem:[%s1150_s10 + $0x30] sm:$0xff] %v564_v2  ;;  %581 = vst [vmem:[%s1150_s10 + $0x38] sm:$0xff] %v565_v10 }
 0x325   : > { %586 = vst [vmem:[%s1150_s10 + $0x60] sm:$0xff] %v570_v4  ;;  %587 = vst [vmem:[%s1150_s10 + $0x68] sm:$0xff] %v571_v12  ;;  %v549_v13 = vpop.permute.xlu1 %548 }
 0x326   : > { %v568_v11 = vmul.f32 %v549_v13, %v1079_v14  ;;  %v569_v16 = vmul.f32 %v549_v13, %v1081_v15 }
 0x328   : > { %584 = vst [vmem:[%s1150_s10 + $0x50] sm:$0xff] %v568_v11  ;;  %585 = vst [vmem:[%s1150_s10 + $0x58] sm:$0xff] %v569_v16 }
 0x329   : > { %v557_v8 = vpop.permute.xlu1 %556 }
 0x32a   : > { %v572_v9 = vmul.f32 %v557_v8, %v1091_v20  ;;  %v573_v14 = vmul.f32 %v557_v8, %v1093_v21 }
 0x32c   : > { %588 = vst [vmem:[%s1150_s10 + $0x70] sm:$0xff] %v572_v9  ;;  %589 = vst [vmem:[%s1150_s10 + $0x78] sm:$0xff] %v573_v14 }
 0x32d   : > { %843 = shalt.err (!%p840_p2)
}
 0x32e   : > { %s844_s15 = scalar_lea.hbm %s1181_s26, 2048  ;;  %s848_s7 = scalar_lea.hbm %s1236_s5, 4096 }
 0x32f   : > { %p845_p4 = scmp.ne.s32.totalorder %s1181_s26, %s844_s15  ;;  %p849_p9 = scmp.lt.u32.totalorder %s1181_s26, %s1236_s5 }
 0x330   : > { %p850_p1 = scmp.lt.u32.totalorder %s848_s7, %s844_s15  ;;  %p852_p6 = scmp.lt.u32.totalorder %s844_s15, %s1181_s26 }
 0x331   : > { %p846_p5 = pnand %p845_p4, %p1243_p11 }
 0x332   : > { %p851_p3 = por %p850_p1, %p849_p9 }
 0x333   : > { %p847_p7 = pneg %p846_p5 }
 0x334   : > { %p853_p12 = por %p852_p6, %p851_p3 }
 0x336   : > { %p854_p13 = pnand %p853_p12, %p847_p7 }
 0x338   : > { %857 = shalt.err (!%p854_p13)
}
 0x339   : > { %s905_s25 = smov 256   ;;  %s906_s13 = smov 16  }
 0x33a   : > { %745 = dma.vmem_to_hbm [thread:$0]  (%p1243_p11), %s1183_s11, 2048, %s1181_s26, %s591_s22, %s905_s25, %s905_s25, %s906_s13  }
 0x33b PF: > { %s619_s17 = sand.u32 1, %s884_s18   ;;  %p1244_p8 = scmp.ne.s32.totalorder %s1241_s6, 0 }
 0x33c   : > { %p1245_p10 = scmp.ge.s32.totalorder %s896_s21, 2  ;;  %s620_s28 = scalar_lea.sflag [#allocation4], %s619_s17 }
 0x33e   : > { %p752_p0 = pnand %p1245_p10, %p1244_p8 }
 0x340   : > { %879 = dma.done.wait (!%p752_p0), %s620_s28, 2048  }
 0x341   : > { %881 = vsyncadd (!%p752_p0), %s620_s28, 4294965248  ;;  %p18_p2 = scmp.ge.s32.totalorder %s962_s24, 4   ;;  %s1246_s18 = smov %s888_s19 }
 0x342   : > { %s1247_s19 = smov %s892_s20  ;;  %s1248_s20 = smov %s974_s27 }
 0x343   : > { %s1249_s21 = smov %s962_s24  ;;  %20 = sbr.rel (!%p18_p2) target bundleno = 5 (0x5), region = 85 }
 0x34a   :  { %625 = vsyncpa [#allocation3], 1 }
 0x34b   :  { %627 = vsyncpa [#allocation3 + $0x1], 1 }
 0x34c   :  { %628 = vsyncpa [#allocation4], 1 }
 0x34d   :  { %630 = vsyncpa [#allocation4 + $0x1], 1 }

</bundles_post_ra>
